<compile_context>
chip_gen: v5e
topology: v5e:2x2
jax: 0.10.0
libtpu: 0.0.40
codegen_flags: <defaults>
</compile_context>

<pallas_src>
import jax
import jax.numpy as jnp
from jax.experimental import pallas as pl
from jax.experimental.pallas import tpu as pltpu


def _make_dense_layer_kernel(num_feats, H, W, Cmid, mxu_dtype):
    HW = H * W
    PAD = W + 1            # zero pad (each side) of the flattened spatial axis

    def kernel(*refs):
        x_refs = refs[:num_feats]                    # each (1, C_i, HW), input dtype
        bn1_refs = refs[num_feats:2 * num_feats]     # each (C_i, 2)  [scale | shift], f32
        w1_ref = refs[2 * num_feats]                 # (Cmid, Cin)    mxu_dtype
        w2_ref = refs[2 * num_feats + 1]             # (Cout, 9*Cmid) mxu_dtype
        bn2_ref = refs[2 * num_feats + 2]            # (Cmid, 2)      f32
        o_ref = refs[2 * num_feats + 3]              # (1, Cout, HW)

        # ---- Stage 1: 1x1 conv of relu(BN1(cat(prev_features))) ----------------
        # Channel concat happens in-register/VMEM; it never round-trips HBM.
        hs = []
        for xr, bnr in zip(x_refs, bn1_refs):
            bn = bnr[...]                                    # (C_i, 2)
            s = bn[:, 0:1]                                   # (C_i, 1)
            t = bn[:, 1:2]
            hs.append(jnp.maximum(xr[0].astype(jnp.float32) * s + t, 0.0))
        h = hs[0] if num_feats == 1 else jnp.concatenate(hs, axis=0)   # (Cin, HW) f32
        y = jnp.dot(w1_ref[...], h.astype(mxu_dtype),
                    preferred_element_type=jnp.float32)                # (Cmid, HW) f32

        # ---- Stage 2 activations: relu(BN2(y)) ----------------------------------
        bn2 = bn2_ref[...]
        z = jnp.maximum(y * bn2[:, 0:1] + bn2[:, 1:2], 0.0).astype(mxu_dtype)

        # ---- 3x3 conv (padding=1) as ONE matmul with K = 9*Cmid -----------------
        # im2col slab from lane-shifted copies of z; height halos come from the
        # zero pads of length PAD, width wraps across row boundaries are masked.
        zeros = jnp.zeros((Cmid, PAD), mxu_dtype)
        zpad = jnp.concatenate([zeros, z, zeros], axis=1)              # (Cmid, HW+2*PAD)
        wi = jax.lax.broadcasted_iota(jnp.int32, (1, HW), 1) % W       # column index
        not_first_col = wi >= 1
        not_last_col = wi <= W - 2

        slabs = []
        for di in (-1, 0, 1):           # kernel row offset (dh - 1)
            for dj in (-1, 0, 1):       # kernel col offset (dw - 1)
                start = PAD + di * W + dj
                tap = zpad[:, start:start + HW]                        # (Cmid, HW)
                if dj == -1:
                    tap = jnp.where(not_first_col, tap, jnp.zeros_like(tap))
                elif dj == 1:
                    tap = jnp.where(not_last_col, tap, jnp.zeros_like(tap))
                slabs.append(tap)
        slab = jnp.concatenate(slabs, axis=0)                          # (9*Cmid, HW)

        out = jnp.dot(w2_ref[...], slab, preferred_element_type=jnp.float32)
        o_ref[0] = out.astype(o_ref.dtype)                             # (Cout, HW)

    return kernel


def dense_layer_forward(prev_features, params, *, eps=1e-5, drop_rate=0.0,
                        training=False, mxu_dtype=jnp.bfloat16):
    """Forward of _DenseLayer (inference path: eval-mode BN, drop_rate == 0).

    prev_features: NCHW tensor or list of NCHW tensors (PyTorch convention).
    """
    if training or drop_rate > 0.0:
        # TODO(synk): training-mode BN statistics and dropout are not implemented.
        raise NotImplementedError("only inference (eval BN, drop_rate=0) is supported")

    if not isinstance(prev_features, (list, tuple)):
        prev_features = [prev_features]
    prev_features = list(prev_features)

    N, _, H, W = prev_features[0].shape
    HW = H * W
    feat_ch = [int(p.shape[1]) for p in prev_features]
    Cin = sum(feat_ch)

    w1 = params["w1"]                    # (Cmid, Cin)        == conv1.weight[:, :, 0, 0]
    w2 = params["w2"]                    # (Cout, Cmid, 3, 3) == conv2.weight
    Cmid, Cout = int(w1.shape[0]), int(w2.shape[0])

    # No concat / transpose: hand each feature map to the kernel as (N, C_i, H*W).
    xs = [p.reshape(N, c, HW) for p, c in zip(prev_features, feat_ch)]
    out_dtype = jnp.result_type(*[p.dtype for p in prev_features])

    # Fold eval-mode BatchNorms into per-channel scale/shift columns (C, 2).
    s1 = params["bn1_gamma"] * jax.lax.rsqrt(params["bn1_var"] + eps)
    t1 = params["bn1_beta"] - params["bn1_mean"] * s1
    s2 = params["bn2_gamma"] * jax.lax.rsqrt(params["bn2_var"] + eps)
    t2 = params["bn2_beta"] - params["bn2_mean"] * s2
    bn2 = jnp.stack([s2, t2], axis=1).astype(jnp.float32)              # (Cmid, 2)
    bn1s, off = [], 0
    for c in feat_ch:
        bn1s.append(jnp.stack([s1[off:off + c], t1[off:off + c]], axis=1)
                    .astype(jnp.float32))                              # (C_i, 2)
        off += c

    # bf16 weights: half the HBM/VMEM footprint, 2x MXU throughput on v6e/v7x.
    w1_k = w1.astype(mxu_dtype)                                        # (Cmid, Cin)
    w2_k = (jnp.transpose(w2, (0, 2, 3, 1))
            .reshape(Cout, 9 * Cmid).astype(mxu_dtype))                # (Cout, 9*Cmid)

    xbytes = max(jnp.dtype(p.dtype).itemsize for p in prev_features)
    mbytes = jnp.dtype(mxu_dtype).itemsize
    obytes = jnp.dtype(out_dtype).itemsize

    # Per-grid-step VMEM footprint (double-buffered pipelined blocks + live temps),
    # capped by the queried per-generation VMEM capacity (v7x: 64 MiB physical).
    est = (
        2 * Cin * HW * xbytes                          # input blocks (dbl-buffered)
        + 2 * Cout * HW * obytes                       # output block (dbl-buffered)
        + 2 * (Cmid * Cin + 9 * Cmid * Cout) * mbytes  # weights (dbl-buffered)
        + 2 * (Cin + Cmid) * 128 * 4                   # BN columns (lane-padded)
        + Cin * HW * (4 + mbytes)                      # normalized activations
        + Cmid * HW * (4 + mbytes)                     # y (f32) + z
        + (HW + 2 * (W + 1)) * Cmid * mbytes           # zero-padded z
        + 10 * Cmid * HW * mbytes                      # 9 taps + im2col slab
        + Cout * HW * 4                                # f32 result before cast
    )
    try:
        vmem_cap = int(pltpu.get_tpu_info().vmem_capacity_bytes)
    except Exception:
        vmem_cap = 64 * 2 ** 20                        # conservative (v7x)
    vmem_limit = int(min(max(int(est * 1.5), 32 * 2 ** 20), (3 * vmem_cap) // 4))

    flops = 2 * N * HW * (Cin * Cmid + 9 * Cmid * Cout)
    bytes_accessed = (N * HW * (Cin * xbytes + Cout * obytes)
                      + (Cmid * Cin + 9 * Cmid * Cout) * mbytes
                      + (Cin + Cmid) * 2 * 4)

    def img_spec(c):
        return pl.BlockSpec((1, c, HW), lambda n: (n, 0, 0))

    def rep_spec(shape):
        return pl.BlockSpec(shape, lambda n: (0, 0))

    kernel = _make_dense_layer_kernel(len(xs), H, W, Cmid, mxu_dtype)

    out_flat = pl.pallas_call(
        kernel,
        out_shape=jax.ShapeDtypeStruct((N, Cout, HW), out_dtype),
        grid_spec=pltpu.PrefetchScalarGridSpec(
            num_scalar_prefetch=0,
            grid=(N,),
            in_specs=([img_spec(c) for c in feat_ch]
                      + [rep_spec((c, 2)) for c in feat_ch]
                      + [rep_spec((Cmid, Cin)),
                         rep_spec((Cout, 9 * Cmid)),
                         rep_spec((Cmid, 2))]),
            out_specs=pl.BlockSpec((1, Cout, HW), lambda n: (n, 0, 0)),
        ),
        compiler_params=pltpu.CompilerParams(
            dimension_semantics=("parallel",),
            vmem_limit_bytes=vmem_limit),
        cost_estimate=pl.CostEstimate(flops=flops, transcendentals=0,
                                      bytes_accessed=bytes_accessed),
    )(*xs, *bn1s, w1_k, w2_k, bn2)

    return out_flat.reshape(N, Cout, H, W)     # free reshape back to NCHW


def make_dense_layer_params(num_input_features, growth_rate, bn_size, key):
    """Random (deterministic from key) parameters matching _DenseLayer's shapes."""
    Cin = num_input_features
    Cmid = bn_size * growth_rate
    Cout = growth_rate
    k = jax.random.split(key, 10)
    return {
        "w1": jax.random.normal(k[0], (Cmid, Cin), jnp.float32) * 0.1,
        "w2": jax.random.normal(k[1], (Cout, Cmid, 3, 3), jnp.float32) * 0.1,
        "bn1_gamma": jax.random.uniform(k[2], (Cin,), jnp.float32, minval=0.5, maxval=1.5),
        "bn1_beta": jax.random.normal(k[3], (Cin,), jnp.float32) * 0.1,
        "bn1_mean": jax.random.normal(k[4], (Cin,), jnp.float32) * 0.1,
        "bn1_var": jax.random.uniform(k[5], (Cin,), jnp.float32, minval=0.5, maxval=1.5),
        "bn2_gamma": jax.random.uniform(k[6], (Cmid,), jnp.float32, minval=0.5, maxval=1.5),
        "bn2_beta": jax.random.normal(k[7], (Cmid,), jnp.float32) * 0.1,
        "bn2_mean": jax.random.normal(k[8], (Cmid,), jnp.float32) * 0.1,
        "bn2_var": jax.random.uniform(k[9], (Cmid,), jnp.float32, minval=0.5, maxval=1.5),
    }


def dense_layer_ref(x_nchw, params, eps=1e-5):
    """Pure-JAX f32 reference of the PyTorch forward (eval-mode BN, drop_rate=0)."""
    N, Cin, H, W = x_nchw.shape
    s1 = params["bn1_gamma"] / jnp.sqrt(params["bn1_var"] + eps)
    t1 = params["bn1_beta"] - params["bn1_mean"] * s1
    h = jnp.maximum(x_nchw * s1[None, :, None, None] + t1[None, :, None, None], 0.0)
    y = jnp.einsum("oc,nchw->nohw", params["w1"], h)
    s2 = params["bn2_gamma"] / jnp.sqrt(params["bn2_var"] + eps)
    t2 = params["bn2_beta"] - params["bn2_mean"] * s2
    z = jnp.maximum(y * s2[None, :, None, None] + t2[None, :, None, None], 0.0)
    zp = jnp.pad(z, ((0, 0), (0, 0), (1, 1), (1, 1)))
    out = jnp.zeros((N, params["w2"].shape[0], H, W), jnp.float32)
    for dh in range(3):
        for dw in range(3):
            out = out + jnp.einsum("oc,nchw->nohw", params["w2"][:, :, dh, dw],
                                   zp[:, :, dh:dh + H, dw:dw + W])
    return out


if __name__ == "__main__":
    # Small _DenseLayer configuration: two previous feature maps of 8 channels each,
    # growth_rate=8, bn_size=4 -> Cin=16, Cmid=32, Cout=8; spatial 16x16, batch 2.
    N, H, W = 2, 16, 16
    growth_rate, bn_size = 8, 4
    feat_channels = (8, 8)
    num_input_features = sum(feat_channels)

    key = jax.random.PRNGKey(0)
    kf0, kf1, kp = jax.random.split(key, 3)
    prev_features = [
        jax.random.normal(kf0, (N, feat_channels[0], H, W), jnp.float32),
        jax.random.normal(kf1, (N, feat_channels[1], H, W), jnp.float32),
    ]
    params = make_dense_layer_params(num_input_features, growth_rate, bn_size, kp)

    out = dense_layer_forward(prev_features, params)
    jax.block_until_ready(out)
    assert out.shape == (N, growth_rate, H, W)

    ref = dense_layer_ref(jnp.concatenate(prev_features, axis=1), params)
    max_err = float(jnp.max(jnp.abs(out - ref)))
    # bf16 MXU operands with f32 accumulation vs. an f32 reference.
    assert max_err < 1e-1, f"max abs err = {max_err}"

    print("KERNEL_OK")
</pallas_src>

<mosaic_0001>
module attributes {stable_mosaic.version = 11 : i64} {
  func.func @kernel(%arg0: i32, %arg1: memref<1x8x256xf32, #tpu.memory_space<vmem>>, %arg2: memref<1x8x256xf32, #tpu.memory_space<vmem>>, %arg3: memref<8x2xf32, #tpu.memory_space<vmem>>, %arg4: memref<8x2xf32, #tpu.memory_space<vmem>>, %arg5: memref<32x16xbf16, #tpu.memory_space<vmem>>, %arg6: memref<8x288xbf16, #tpu.memory_space<vmem>>, %arg7: memref<32x2xf32, #tpu.memory_space<vmem>>, %arg8: memref<1x8x256xf32, #tpu.memory_space<vmem>>) attributes {dimension_semantics = [#tpu.dimension_semantics<parallel>], iteration_bounds = array<i64: 2>, scalar_prefetch = 0 : i64, scratch_operands = 0 : i64, tpu.core_type = #tpu.core_type<tc>, window_params = [{transform_indices = @transform_0, window_bounds = array<i64: 1, 8, 256>}, {transform_indices = @transform_1, window_bounds = array<i64: 1, 8, 256>}, {pipeline_mode = #tpu.pipeline_mode<synchronous>, transform_indices = @transform_2, window_bounds = array<i64: 8, 2>}, {pipeline_mode = #tpu.pipeline_mode<synchronous>, transform_indices = @transform_3, window_bounds = array<i64: 8, 2>}, {pipeline_mode = #tpu.pipeline_mode<synchronous>, transform_indices = @transform_4, window_bounds = array<i64: 32, 16>}, {pipeline_mode = #tpu.pipeline_mode<synchronous>, transform_indices = @transform_5, window_bounds = array<i64: 8, 288>}, {pipeline_mode = #tpu.pipeline_mode<synchronous>, transform_indices = @transform_6, window_bounds = array<i64: 32, 2>}, {transform_indices = @transform_7, window_bounds = array<i64: 1, 8, 256>}]} {
    %c0 = arith.constant 0 : index
    %c0_0 = arith.constant 0 : index
    %0 = vector.load %arg3[%c0, %c0_0] : memref<8x2xf32, #tpu.memory_space<vmem>>, vector<8x2xf32>
    %1 = vector.extract_strided_slice %0 {offsets = [0, 0], sizes = [8, 1], strides = [1, 1]} : vector<8x2xf32> to vector<8x1xf32>
    %2 = vector.extract_strided_slice %0 {offsets = [0, 1], sizes = [8, 1], strides = [1, 1]} : vector<8x2xf32> to vector<8x1xf32>
    %c0_1 = arith.constant 0 : index
    %c0_2 = arith.constant 0 : index
    %c0_3 = arith.constant 0 : index
    %3 = vector.load %arg1[%c0_1, %c0_2, %c0_3] : memref<1x8x256xf32, #tpu.memory_space<vmem>>, vector<1x8x256xf32>
    %4 = vector.shape_cast %3 : vector<1x8x256xf32> to vector<8x256xf32>
    %5 = vector.broadcast %1 : vector<8x1xf32> to vector<8x256xf32>
    %6 = arith.mulf %4, %5 : vector<8x256xf32>
    %7 = vector.broadcast %2 : vector<8x1xf32> to vector<8x256xf32>
    %8 = arith.addf %6, %7 : vector<8x256xf32>
    %cst = arith.constant 0.000000e+00 : f32
    %9 = vector.broadcast %cst : f32 to vector<8x256xf32>
    %10 = arith.maximumf %8, %9 : vector<8x256xf32>
    %c0_4 = arith.constant 0 : index
    %c0_5 = arith.constant 0 : index
    %11 = vector.load %arg4[%c0_4, %c0_5] : memref<8x2xf32, #tpu.memory_space<vmem>>, vector<8x2xf32>
    %12 = vector.extract_strided_slice %11 {offsets = [0, 0], sizes = [8, 1], strides = [1, 1]} : vector<8x2xf32> to vector<8x1xf32>
    %13 = vector.extract_strided_slice %11 {offsets = [0, 1], sizes = [8, 1], strides = [1, 1]} : vector<8x2xf32> to vector<8x1xf32>
    %c0_6 = arith.constant 0 : index
    %c0_7 = arith.constant 0 : index
    %c0_8 = arith.constant 0 : index
    %14 = vector.load %arg2[%c0_6, %c0_7, %c0_8] : memref<1x8x256xf32, #tpu.memory_space<vmem>>, vector<1x8x256xf32>
    %15 = vector.shape_cast %14 : vector<1x8x256xf32> to vector<8x256xf32>
    %16 = vector.broadcast %12 : vector<8x1xf32> to vector<8x256xf32>
    %17 = arith.mulf %15, %16 : vector<8x256xf32>
    %18 = vector.broadcast %13 : vector<8x1xf32> to vector<8x256xf32>
    %19 = arith.addf %17, %18 : vector<8x256xf32>
    %cst_9 = arith.constant 0.000000e+00 : f32
    %20 = vector.broadcast %cst_9 : f32 to vector<8x256xf32>
    %21 = arith.maximumf %19, %20 : vector<8x256xf32>
    %22 = tpu.concatenate %10, %21 in 0 : vector<8x256xf32>, vector<8x256xf32> -> vector<16x256xf32>
    %c0_10 = arith.constant 0 : index
    %c0_11 = arith.constant 0 : index
    %23 = vector.load %arg5[%c0_10, %c0_11] : memref<32x16xbf16, #tpu.memory_space<vmem>>, vector<32x16xbf16>
    %24 = arith.truncf %22 : vector<16x256xf32> to vector<16x256xbf16>
    %cst_12 = arith.constant dense<0.000000e+00> : vector<32x256xf32>
    %25 = tpu.matmul %23, %24, %cst_12 {dimension_numbers = #tpu.dot_dimension_numbers<[1], [0], [0], [1], [0, 0, 1, 1], [], []>} : vector<32x16xbf16>, vector<16x256xbf16>, vector<32x256xf32> -> vector<32x256xf32>
    %c0_13 = arith.constant 0 : index
    %c0_14 = arith.constant 0 : index
    %26 = vector.load %arg7[%c0_13, %c0_14] : memref<32x2xf32, #tpu.memory_space<vmem>>, vector<32x2xf32>
    %27 = vector.extract_strided_slice %26 {offsets = [0, 0], sizes = [32, 1], strides = [1, 1]} : vector<32x2xf32> to vector<32x1xf32>
    %28 = vector.broadcast %27 : vector<32x1xf32> to vector<32x256xf32>
    %29 = arith.mulf %25, %28 : vector<32x256xf32>
    %30 = vector.extract_strided_slice %26 {offsets = [0, 1], sizes = [32, 1], strides = [1, 1]} : vector<32x2xf32> to vector<32x1xf32>
    %31 = vector.broadcast %30 : vector<32x1xf32> to vector<32x256xf32>
    %32 = arith.addf %29, %31 : vector<32x256xf32>
    %cst_15 = arith.constant 0.000000e+00 : f32
    %33 = vector.broadcast %cst_15 : f32 to vector<32x256xf32>
    %34 = arith.maximumf %32, %33 : vector<32x256xf32>
    %35 = arith.truncf %34 : vector<32x256xf32> to vector<32x256xbf16>
    %cst_16 = arith.constant 0.000000e+00 : bf16
    %36 = vector.broadcast %cst_16 : bf16 to vector<32x17xbf16>
    %37 = tpu.concatenate %36, %35, %36 in 1 : vector<32x17xbf16>, vector<32x256xbf16>, vector<32x17xbf16> -> vector<32x290xbf16>
    %38 = tpu.iota {dimensions = array<i32: 1>} : vector<1x256xi32>
    %c16_i32 = arith.constant 16 : i32
    %c0_i32 = arith.constant 0 : i32
    %39 = arith.cmpi eq, %c16_i32, %c0_i32 : i32
    %c1_i32 = arith.constant 1 : i32
    %40 = arith.select %39, %c1_i32, %c16_i32 : i32
    %41 = vector.broadcast %40 : i32 to vector<1x256xi32>
    %42 = arith.remsi %38, %41 : vector<1x256xi32>
    %c0_i32_17 = arith.constant 0 : i32
    %43 = vector.broadcast %c0_i32_17 : i32 to vector<1x256xi32>
    %44 = arith.cmpi ne, %42, %43 : vector<1x256xi32>
    %c0_i32_18 = arith.constant 0 : i32
    %45 = vector.broadcast %c0_i32_18 : i32 to vector<1x256xi32>
    %46 = arith.cmpi slt, %42, %45 : vector<1x256xi32>
    %c0_i32_19 = arith.constant 0 : i32
    %47 = arith.cmpi slt, %40, %c0_i32_19 : i32
    %48 = vector.broadcast %47 : i1 to vector<1x256xi1>
    %49 = vector.broadcast %48 : vector<1x256xi1> to vector<1x256xi1>
    %50 = arith.xori %46, %49 : vector<1x256xi1>
    %51 = arith.andi %50, %44 : vector<1x256xi1>
    %52 = vector.broadcast %40 : i32 to vector<1x256xi32>
    %53 = arith.addi %42, %52 : vector<1x256xi32>
    %54 = arith.select %51, %53, %42 : vector<1x256xi1>, vector<1x256xi32>
    %c1_i32_20 = arith.constant 1 : i32
    %55 = vector.broadcast %c1_i32_20 : i32 to vector<1x256xi32>
    %56 = arith.cmpi sge, %54, %55 : vector<1x256xi32>
    %c14_i32 = arith.constant 14 : i32
    %57 = vector.broadcast %c14_i32 : i32 to vector<1x256xi32>
    %58 = arith.cmpi sle, %54, %57 : vector<1x256xi32>
    %59 = vector.extract_strided_slice %37 {offsets = [0, 0], sizes = [32, 256], strides = [1, 1]} : vector<32x290xbf16> to vector<32x256xbf16>
    %cst_21 = arith.constant 0.000000e+00 : bf16
    %60 = vector.broadcast %cst_21 : bf16 to vector<32x256xbf16>
    %61 = vector.shape_cast %56 : vector<1x256xi1> to vector<1x256xi1>
    %62 = vector.broadcast %61 : vector<1x256xi1> to vector<32x256xi1>
    %63 = arith.select %62, %59, %60 : vector<32x256xi1>, vector<32x256xbf16>
    %64 = vector.extract_strided_slice %37 {offsets = [0, 1], sizes = [32, 256], strides = [1, 1]} : vector<32x290xbf16> to vector<32x256xbf16>
    %65 = vector.extract_strided_slice %37 {offsets = [0, 2], sizes = [32, 256], strides = [1, 1]} : vector<32x290xbf16> to vector<32x256xbf16>
    %cst_22 = arith.constant 0.000000e+00 : bf16
    %66 = vector.broadcast %cst_22 : bf16 to vector<32x256xbf16>
    %67 = vector.shape_cast %58 : vector<1x256xi1> to vector<1x256xi1>
    %68 = vector.broadcast %67 : vector<1x256xi1> to vector<32x256xi1>
    %69 = arith.select %68, %65, %66 : vector<32x256xi1>, vector<32x256xbf16>
    %70 = vector.extract_strided_slice %37 {offsets = [0, 16], sizes = [32, 256], strides = [1, 1]} : vector<32x290xbf16> to vector<32x256xbf16>
    %cst_23 = arith.constant 0.000000e+00 : bf16
    %71 = vector.broadcast %cst_23 : bf16 to vector<32x256xbf16>
    %72 = vector.shape_cast %56 : vector<1x256xi1> to vector<1x256xi1>
    %73 = vector.broadcast %72 : vector<1x256xi1> to vector<32x256xi1>
    %74 = arith.select %73, %70, %71 : vector<32x256xi1>, vector<32x256xbf16>
    %75 = vector.extract_strided_slice %37 {offsets = [0, 17], sizes = [32, 256], strides = [1, 1]} : vector<32x290xbf16> to vector<32x256xbf16>
    %76 = vector.extract_strided_slice %37 {offsets = [0, 18], sizes = [32, 256], strides = [1, 1]} : vector<32x290xbf16> to vector<32x256xbf16>
    %cst_24 = arith.constant 0.000000e+00 : bf16
    %77 = vector.broadcast %cst_24 : bf16 to vector<32x256xbf16>
    %78 = vector.shape_cast %58 : vector<1x256xi1> to vector<1x256xi1>
    %79 = vector.broadcast %78 : vector<1x256xi1> to vector<32x256xi1>
    %80 = arith.select %79, %76, %77 : vector<32x256xi1>, vector<32x256xbf16>
    %81 = vector.extract_strided_slice %37 {offsets = [0, 32], sizes = [32, 256], strides = [1, 1]} : vector<32x290xbf16> to vector<32x256xbf16>
    %cst_25 = arith.constant 0.000000e+00 : bf16
    %82 = vector.broadcast %cst_25 : bf16 to vector<32x256xbf16>
    %83 = vector.shape_cast %56 : vector<1x256xi1> to vector<1x256xi1>
    %84 = vector.broadcast %83 : vector<1x256xi1> to vector<32x256xi1>
    %85 = arith.select %84, %81, %82 : vector<32x256xi1>, vector<32x256xbf16>
    %86 = vector.extract_strided_slice %37 {offsets = [0, 33], sizes = [32, 256], strides = [1, 1]} : vector<32x290xbf16> to vector<32x256xbf16>
    %87 = vector.extract_strided_slice %37 {offsets = [0, 34], sizes = [32, 256], strides = [1, 1]} : vector<32x290xbf16> to vector<32x256xbf16>
    %cst_26 = arith.constant 0.000000e+00 : bf16
    %88 = vector.broadcast %cst_26 : bf16 to vector<32x256xbf16>
    %89 = vector.shape_cast %58 : vector<1x256xi1> to vector<1x256xi1>
    %90 = vector.broadcast %89 : vector<1x256xi1> to vector<32x256xi1>
    %91 = arith.select %90, %87, %88 : vector<32x256xi1>, vector<32x256xbf16>
    %92 = tpu.concatenate %63, %64, %69, %74, %75, %80, %85, %86, %91 in 0 : vector<32x256xbf16>, vector<32x256xbf16>, vector<32x256xbf16>, vector<32x256xbf16>, vector<32x256xbf16>, vector<32x256xbf16>, vector<32x256xbf16>, vector<32x256xbf16>, vector<32x256xbf16> -> vector<288x256xbf16>
    %c0_27 = arith.constant 0 : index
    %c0_28 = arith.constant 0 : index
    %93 = vector.load %arg6[%c0_27, %c0_28] : memref<8x288xbf16, #tpu.memory_space<vmem>>, vector<8x288xbf16>
    %cst_29 = arith.constant dense<0.000000e+00> : vector<8x256xf32>
    %94 = tpu.matmul %93, %92, %cst_29 {dimension_numbers = #tpu.dot_dimension_numbers<[1], [0], [0], [1], [0, 0, 1, 1], [], []>} : vector<8x288xbf16>, vector<288x256xbf16>, vector<8x256xf32> -> vector<8x256xf32>
    %c0_30 = arith.constant 0 : index
    %c0_31 = arith.constant 0 : index
    %c0_32 = arith.constant 0 : index
    %95 = vector.load %arg8[%c0_30, %c0_31, %c0_32] : memref<1x8x256xf32, #tpu.memory_space<vmem>>, vector<1x8x256xf32>
    %96 = vector.shape_cast %95 : vector<1x8x256xf32> to vector<8x256xf32>
    %97 = vector.shape_cast %94 : vector<8x256xf32> to vector<1x8x256xf32>
    tpu.vector_store %arg8[%c0_30, %c0_31, %c0_32], %97 {strides = array<i32>} : memref<1x8x256xf32, #tpu.memory_space<vmem>>, vector<1x8x256xf32>,
    return
  }
  func.func @transform_0(%arg0: i32) -> (i32, i32, i32) {
    %c0_i32 = arith.constant 0 : i32
    %c0_i32_0 = arith.constant 0 : i32
    %c0_i32_1 = arith.constant 0 : i32
    return %arg0, %c0_i32, %c0_i32_0 : i32, i32, i32
  }
  func.func @transform_1(%arg0: i32) -> (i32, i32, i32) {
    %c0_i32 = arith.constant 0 : i32
    %c0_i32_0 = arith.constant 0 : i32
    %c0_i32_1 = arith.constant 0 : i32
    return %arg0, %c0_i32, %c0_i32_0 : i32, i32, i32
  }
  func.func @transform_2(%arg0: i32) -> (i32, i32) {
    %c0_i32 = arith.constant 0 : i32
    %c0_i32_0 = arith.constant 0 : i32
    %c0_i32_1 = arith.constant 0 : i32
    return %c0_i32, %c0_i32_0 : i32, i32
  }
  func.func @transform_3(%arg0: i32) -> (i32, i32) {
    %c0_i32 = arith.constant 0 : i32
    %c0_i32_0 = arith.constant 0 : i32
    %c0_i32_1 = arith.constant 0 : i32
    return %c0_i32, %c0_i32_0 : i32, i32
  }
  func.func @transform_4(%arg0: i32) -> (i32, i32) {
    %c0_i32 = arith.constant 0 : i32
    %c0_i32_0 = arith.constant 0 : i32
    %c0_i32_1 = arith.constant 0 : i32
    return %c0_i32, %c0_i32_0 : i32, i32
  }
  func.func @transform_5(%arg0: i32) -> (i32, i32) {
    %c0_i32 = arith.constant 0 : i32
    %c0_i32_0 = arith.constant 0 : i32
    %c0_i32_1 = arith.constant 0 : i32
    return %c0_i32, %c0_i32_0 : i32, i32
  }
  func.func @transform_6(%arg0: i32) -> (i32, i32) {
    %c0_i32 = arith.constant 0 : i32
    %c0_i32_0 = arith.constant 0 : i32
    %c0_i32_1 = arith.constant 0 : i32
    return %c0_i32, %c0_i32_0 : i32, i32
  }
  func.func @transform_7(%arg0: i32) -> (i32, i32, i32) {
    %c0_i32 = arith.constant 0 : i32
    %c0_i32_0 = arith.constant 0 : i32
    %c0_i32_1 = arith.constant 0 : i32
    return %arg0, %c0_i32, %c0_i32_0 : i32, i32, i32
  }
}

</mosaic_0001>

<bundles_post_ra>
// kernel: tpu_custom_call.1
= control target key start
LH: loop header
LB: loop body
LE: loop exit
PB: predicated region body
PF: predicated region fallthrough
CT: control target
= control target key end

     0   :  { %12 = vsyncpa [#allocation3], 0  ;;  %s2135_s0 = inlined_call_operand.vmem [shape: f32[2,8,256], index: 0, kind: input, shape index: {}]   ;;  %s2136_s1 = inlined_call_operand.vmem [shape: f32[2,8,256], index: 1, kind: input, shape index: {}]   ;;  %s2137_s2 = inlined_call_operand.vmem [shape: f32[8,2], index: 2, kind: input, shape index: {}]   ;;  %s2138_s3 = inlined_call_operand.vmem [shape: f32[8,2], index: 3, kind: input, shape index: {}]   ;;  %s2139_s4 = inlined_call_operand.vmem [shape: bf16[32,16], index: 4, kind: input, shape index: {}]   ;;  %s2140_s5 = inlined_call_operand.vmem [shape: bf16[8,288], index: 5, kind: input, shape index: {}]   ;;  %s2141_s6 = inlined_call_operand.vmem [shape: f32[32,2], index: 6, kind: input, shape index: {}]   ;;  %s2142_s7 = inlined_call_operand.hbm [shape: f32[2,8,256], index: 7, kind: output, shape index: {}]  }
   0x1   :  { %14 = vsyncpa [#allocation3 + $0x1], 0  ;;  %s1338_s24 = smov 0   ;;  %s1340_s25 = smov 0  }
   0x2   :  { %s1342_s26 = smov 0   ;;  %s1344_s27 = smov 0  }
   0x3 LB: > { %s1359_s28 = sadd.s32 4294967295, %s1280_s27   ;;  %s1124_s29 = sadd.s32 4294967294, %s1280_s27   ;;  %s1280_s27 = sphi %s1344_s27, %s2306_s27   ;;  %s1276_s26 = sphi %s1342_s26, %s2305_s26   ;;  %s1272_s25 = sphi %s1340_s25, %s2304_s25   ;;  %s1268_s24 = sphi %s1338_s24, %s2303_s24  }
   0x4   : > { %s1363_s30 = sadd.s32 1, %s1280_s27   ;;  %s184_s8 = sadd.s32 1, %s1276_s26 }
   0x5   : > { %s181_s9 = ssub.s32 %s1280_s27, %s1363_s30  ;;  %p194_p0 = scmp.ne.s32.totalorder %s1276_s26, %s1272_s25 }
   0x6   : > { %p182_p1 = scmp.eq.s32.totalorder %s181_s9, 0  ;;  %p195_p2 = scmp.eq.s32.totalorder %s1359_s28, 1 }
   0x7   : > { %p200_p3 = scmp.ne.s32.totalorder %s1272_s25, %s1268_s24  ;;  %p201_p4 = scmp.eq.s32.totalorder %s1124_s29, 1 }
   0x8   : > { %s1374_s10 = scalar_select %p182_p1, %s1276_s26, %s184_s8  }
   0x9   : > { %p1376_p5 = por %p195_p2, %p194_p0  ;;  %p1380_p6 = por %p201_p4, %p200_p3 }
   0xa   : > { %p1127_p7 = scmp.ge.s32.totalorder %s1280_s27, 1  ;;  %p250_p8 = scmp.lt.s32.totalorder %s1280_s27, 3 }
   0xc   : > { %p251_p9 = pnand %p1127_p7, %p250_p8 }
   0xd   : > { %p287_p10 = scmp.lt.s32.totalorder (!%p251_p9), %s1359_s28, 1  ;;  %s1286_s8 = smov (!%p251_p9), 16  }
   0xe   : > { %254 = sbr.rel (%p251_p9) target bundleno = 800 (0x320), region = 48  ;;  %s1287_s9 = smov (!%p251_p9), 34  }
   0xf   : > { %s1289_s14 = smov (!%p251_p9), 17   ;;  %s1290_s15 = smov (!%p251_p9), 95  }
  0x10   : > { %s1292_s17 = smov (!%p251_p9), 96   ;;  %s1293_s18 = smov (!%p251_p9), 110  }
  0x11   : > { %s1294_s19 = smov (!%p251_p9), 112   ;;  %s1295_s20 = smov (!%p251_p9), 94  }
  0x12   : > { %s1296_s21 = smov (!%p251_p9), 126   ;;  %s1297_s22 = smov (!%p251_p9), 127  }
  0x13   : > { %v300_v0 = vld [vmem:[%s2137_s2] sm:$0xff]  ;;  %v1282_v1 = vmov 1   ;;  %v1283_v2 = vmov 0   ;;  %v400_v4 = vld [vmem:[%s2141_s6 + $0x18] sm:$0xff]  ;;  %v399_v5 = vld [vmem:[%s2141_s6 + $0x10] sm:$0xff]  ;;  %s288_s23 = scalar_select %p287_p10, %s1359_s28, 1  ;;  %v508_v32 = vlaneseq }
  0x14   : > { %1213 = vset.pattern.permute.xlu1 %v1282_v1  ;;  %1212 = vset.pattern.permute.xlu0 %v1283_v2  ;;  %v318_v3 = vld [vmem:[%s2138_s3] sm:$0xff]  ;;  %v398_v6 = vld [vmem:[%s2141_s6 + $0x8] sm:$0xff]  ;;  %vm2143_vm0 = vcmask 130048  }
  0x15   : > { %311 = vperm.xlu1 %1213, %v300_v0   ;;  %305 = vperm.xlu0 %1212, %v300_v0   ;;  %s1152_s29 = sshll.u32 %s288_s23, 4  ;;  %v397_v11 = vld [vmem:[%s2141_s6] sm:$0xff]  ;;  %v1155_v31 = vld [vmem:[%s2139_s4 + $0x8] sm:$0xff]  ;;  %v509_v33 = vand.u32 127, %v508_v32  ;;  %s1284_s23 = smov 32  }
  0x16   : > { %1214 = vset.pattern.permute.xlu2 %v1283_v2  ;;  %s291_s13 = scalar_lea.vmem %s2135_s0, %s1152_s29  ;;  %s296_s16 = scalar_lea.vmem %s2136_s1, %s1152_s29  ;;  %v1154_v30 = vld [vmem:[%s2139_s4] sm:$0xff] }
  0x17   : > { %413 = vperm.xlu2 %1214, %v399_v5   ;;  %v301_v9 = vld [vmem:[%s291_s13] sm:$0xff]  ;;  %v302_v10 = vld [vmem:[%s291_s13 + $0x8] sm:$0xff]  ;;  %v510_v34 = vadd.s32 128, %v509_v33  ;;  %v515_v35 = vand.u32 15, %v509_v33  ;;  %s1285_s29 = smov 18   ;;  %s1288_s13 = smov 2  }
  0x18   : > { %v319_v14 = vld [vmem:[%s296_s16] sm:$0xff]  ;;  %v320_v15 = vld [vmem:[%s296_s16 + $0x8] sm:$0xff]  ;;  %s1291_s16 = smov 111  }
  0x19   : > { %v522_v36 = vand.u32 15, %v510_v34  ;;  %vm535_vm1 = vcmp.ge.s32.totalorder %v515_v35, 1  ;;  %vm537_vm3 = vcmp.le.s32.totalorder %v515_v35, 14 }
  0x1b   : > { %vm536_vm2 = vcmp.ge.s32.totalorder %v522_v36, 1  ;;  %vm538_vm4 = vcmp.le.s32.totalorder %v522_v36, 14 }
  0x1c   : > { %vm543_vm5 = vmpackc.low %vm536_vm2, %vm535_vm1  ;;  %vm2144_vm1 = vcmask 138240  }
  0x1d   : > { %329 = vperm.xlu1 %1213, %v318_v3   ;;  %323 = vperm.xlu0 %1212, %v318_v3   ;;  %v544_v37 = vsel %vm543_vm5, 65537, %v1283_v2  ;;  %vm569_vm6 = vmpackc.low %vm538_vm4, %vm537_vm3 }
  0x1e   : > { %v1426_v38 = vperm.slane %v544_v37, 4  ;;  %v570_v39 = vsel %vm569_vm6, 65537, %v1283_v2  ;;  %v1430_v40 = vperm.slane %v544_v37, 0 }
  0x1f   : > { %418 = vperm.xlu2 %1214, %v400_v4   ;;  %v571_v41 = vperm.slane %v570_v39, 0  ;;  %v572_v42 = vperm.slane %v570_v39, 4  ;;  %v1440_v39 = vunpack.c.l.b16 %v1283_v2 }
  0x25   : > { %442 = vperm.xlu1 %1213, %v400_v4   ;;  %1215 = vset.pattern.permute.xlu0 %v1282_v1 }
  0x26   : > { %438 = vperm.xlu0 %1215, %v399_v5  }
  0x27   : > { %403 = vperm.xlu2 %1214, %v397_v11  }
  0x2d   : > { %1216 = vset.pattern.permute.xlu1 %v1283_v2 }
  0x2e   : > { %408 = vperm.xlu1 %1216, %v398_v6   ;;  %434 = vperm.xlu0 %1215, %v398_v6  }
  0x2f   : > { %1217 = vset.pattern.permute.xlu2 %v1282_v1 }
  0x30   : > { %430 = vperm.xlu2 %1217, %v397_v11  }
  0x36   : > { %674 = vrot.lane.b32.xlu1 %v1426_v38, %s1284_s23  ;;  %672 = vrot.lane.b32.xlu0 %v1430_v40, %s1284_s23 }
  0x38   : > { %641 = vrot.lane.b32.xlu2 %v572_v42, %s1285_s29 }
  0x3e   : > { %639 = vrot.lane.b32.xlu1 %v571_v41, %s1285_s29  ;;  %606 = vrot.lane.b32.xlu0 %v1430_v40, %s1286_s8 }
  0x40   : > { %705 = vrot.lane.b32.xlu2 %v571_v41, %s1287_s9 }
  0x46   : > { %608 = vrot.lane.b32.xlu1 %v1426_v38, %s1286_s8  ;;  %707 = vrot.lane.b32.xlu0 %v572_v42, %s1287_s9  ;;  %s1238_s9 = scalar_lea.hbm %s2142_s7, 32 }
  0x48   : > { %575 = vrot.lane.b32.xlu2 %v572_v42, %s1288_s13  ;;  %v547_v42 = vunpack.c.l.b16 %v1430_v40 }
  0x4a   : > { %vm1450_vm7 = vcmp.ne.s32.totalorder %v547_v42, %v1440_v39 }
  0x4e   : > { %573 = vrot.lane.b32.xlu1 %v571_v41, %s1288_s13  ;;  %v1443_v41 = vunpack.c.h.b16 %v1283_v2  ;;  %s284_s13 = sand.u32 1, %s1272_s25  }
  0x71   : > { %v414_v43 = vpop.permute.xlu2 %413 }
  0x79   : > { %v419_v44 = vpop.permute.xlu2 %418 }
  0x81   : > { %v404_v45 = vpop.permute.xlu2 %403 }
  0x87   : > { %v312_v7 = vpop.permute.xlu1 %311  ;;  %v306_v8 = vpop.permute.xlu0 %305 }
  0x88   : > { %v308_v12 = vmul.f32 %v306_v8, %v301_v9  ;;  %v309_v13 = vmul.f32 %v306_v8, %v302_v10 }
  0x8a   : > { %v314_v19 = vadd.f32 %v312_v7, %v308_v12  ;;  %v315_v20 = vadd.f32 %v312_v7, %v309_v13  ;;  %v431_v52 = vpop.permute.xlu2 %430 }
  0x8c   : > { %v316_v24 = vmax.f32 %v314_v19, 0.0  ;;  %v317_v26 = vmax.f32 %v315_v20, 0.0 }
  0x8f   : > { %v324_v16 = vpop.permute.xlu0 %323  ;;  %v330_v21 = vpop.permute.xlu1 %329 }
  0x90   : > { %v326_v17 = vmul.f32 %v324_v16, %v319_v14  ;;  %v327_v18 = vmul.f32 %v324_v16, %v320_v15 }
  0x92   : > { %v332_v22 = vadd.f32 %v330_v21, %v326_v17  ;;  %v333_v23 = vadd.f32 %v330_v21, %v327_v18  ;;  %v1437_v37 = vpop.permute.xlu2 %641 }
  0x94   : > { %v334_v25 = vmax.f32 %v332_v22, 0.0  ;;  %v335_v27 = vmax.f32 %v333_v23, 0.0 }
  0x96   : > { %v340_v28 = vpack.c.bf16 %v334_v25, %v316_v24  ;;  %v341_v29 = vpack.c.bf16 %v335_v27, %v317_v26 }
  0x97   : > { %v443_v46 = vpop.permute.xlu1 %442 }
  0x98   : > { %366 = vmatpush.bf16.msra.mxu0 %v340_v28  ;;  %385 = vmatpush.bf16.msra.mxu1 %v341_v29  ;;  %v439_v47 = vpop.permute.xlu0 %438 }
  0x9a   : > { %v1463_v2 = vpop.permute.xlu2 %705 }
  0x9b   : > { %1141 = vmatmul.msk.bf16.vlgmr.msra.gmra.mxu0 %vm2143_vm0, %v1154_v30  ;;  %1143 = vmatmul.msk.bf16.vlgmr.msra.gmra.mxu1 %vm2143_vm0, %v1154_v30 }
  0xa0   : > { %v409_v55 = vpop.permute.xlu1 %408  ;;  %v435_v62 = vpop.permute.xlu0 %434 }
  0xa8   : > { %v1435_v36 = vpop.permute.xlu0 %672 }
  0xab   : > { %1142 = vmatmul.msk.bf16.gmra.mxu0 %vm2143_vm0, %v1155_v31  ;;  %1144 = vmatmul.msk.bf16.gmra.mxu1 %vm2143_vm0, %v1155_v31 }
 0x118   : > { %v368_v48 = vpop.f32.mrf.mxu0  ;;  %v387_v49 = vpop.f32.mrf.mxu1 }
 0x119   : > { %v421_v50 = vmul.f32 %v404_v45, %v368_v48  ;;  %v422_v51 = vmul.f32 %v404_v45, %v387_v49  ;;  %v2182_v45 = vmov 0  ;;  %v1469_v49 = vpop.permute.xlu1 %674 }
 0x11a   : > { %v2183_v45 = vsel %vm1450_vm7, 4294967295, %v2182_v45 }
 0x11b   : > { %v445_v53 = vadd.f32 %v431_v52, %v421_v50  ;;  %v446_v54 = vadd.f32 %v431_v52, %v422_v51  ;;  %v2186_v50 = vmov 0  ;;  %v2188_v51 = vmov 0  ;;  %v1485_v52 = vpop.permute.xlu2 %575 }
 0x11d   : > { %v453_v56 = vmax.f32 %v445_v53, 0.0  ;;  %v454_v57 = vmax.f32 %v446_v54, 0.0  ;;  %v554_v53 = vunpack.c.l.b16 %v1426_v38  ;;  %v555_v54 = vunpack.c.h.b16 %v1426_v38 }
 0x11f   : > { %v461_v1 = vpack.c.bf16 %v454_v57, %v453_v56  ;;  %vm1490_vm13 = vcmp.ne.s32.totalorder %v554_v53, %v1440_v39  ;;  %vm1495_vm14 = vcmp.ne.s32.totalorder %v555_v54, %v1443_v41  ;;  %v2192_v56 = vmov 0 }
 0x120   : > { %v370_v58 = vpop.f32.mrf.mxu0  ;;  %v389_v59 = vpop.f32.mrf.mxu1  ;;  %v2193_v56 = vsel %vm1495_vm14, 4294967295, %v2192_v56 }
 0x121   : > { %v423_v60 = vmul.f32 %v409_v55, %v370_v58  ;;  %v424_v61 = vmul.f32 %v409_v55, %v389_v59  ;;  %v470_v8 = vunpack.c.h.b16 %v461_v1  ;;  %v469_v9 = vunpack.c.l.b16 %v461_v1  ;;  %v640_v57 = vpop.permute.xlu1 %639 }
 0x122   : > { %v2190_v55 = vmov 0  ;;  %v594_v1 = vunpack.c.h.b16 %v1485_v52 }
 0x123   : > { %v447_v63 = vadd.f32 %v435_v62, %v423_v60  ;;  %v448_v0 = vadd.f32 %v435_v62, %v424_v61  ;;  %v2191_v55 = vsel %vm1490_vm13, 4294967295, %v2190_v55  ;;  %v692_v62 = vunpack.c.l.b16 %v1469_v49 }
 0x124   : > { %vm1540_vm15 = vcmp.ne.s32.totalorder %v594_v1, %v1443_v41  ;;  %vm2210_vm13 = vcmask 138240  }
 0x125   : > { %v455_v3 = vmax.f32 %v447_v63, 0.0  ;;  %v456_v4 = vmax.f32 %v448_v0, 0.0  ;;  %v693_v63 = vunpack.c.h.b16 %v1469_v49  ;;  %v593_v0 = vunpack.c.l.b16 %v1485_v52 }
 0x126   : > { %vm1525_vm4 = vcmp.ne.s32.totalorder %v692_v62, %v1440_v39  ;;  %v2229_v62 = vmov 0 }
 0x127   : > { %v462_v5 = vpack.c.bf16 %v456_v4, %v455_v3  ;;  %v659_v3 = vunpack.c.l.b16 %v1437_v37  ;;  %v660_v4 = vunpack.c.h.b16 %v1437_v37  ;;  %vm1530_vm5 = vcmp.ne.s32.totalorder %v693_v63, %v1443_v41 }
 0x128   : > { %v373_v6 = vpop.f32.mrf.mxu0  ;;  %v392_v7 = vpop.f32.mrf.mxu1  ;;  %vm1535_vm6 = vcmp.ne.s32.totalorder %v593_v0, %v1440_v39  ;;  %v2231_v63 = vmov 0 }
 0x129   : > { %v425_v10 = vmul.f32 %v414_v43, %v373_v6  ;;  %v426_v11 = vmul.f32 %v414_v43, %v392_v7  ;;  %v472_v12 = vunpack.c.h.b16 %v462_v5  ;;  %v471_v13 = vunpack.c.l.b16 %v462_v5  ;;  %v609_v59 = vpop.permute.xlu1 %608  ;;  %vm2150_vm9 = vmpackc.low %vm1540_vm15, %vm1535_vm6 }
 0x12a   : > { %v548_v43 = vunpack.c.h.b16 %v1430_v40  ;;  %v626_v60 = vunpack.c.l.b16 %v609_v59  ;;  %v627_v61 = vunpack.c.h.b16 %v609_v59  ;;  %v2194_v5 = vmov 0 }
 0x12b   : > { %v478_v14 = vpack.c.b16 %v472_v12, %v470_v8  ;;  %v477_v15 = vpack.c.b16 %v471_v13, %v469_v9  ;;  %v449_v16 = vadd.f32 %v439_v47, %v425_v10  ;;  %v450_v17 = vadd.f32 %v439_v47, %v426_v11 }
 0x12c   : > { %vm1455_vm8 = vcmp.ne.s32.totalorder %v548_v43, %v1443_v41  ;;  %vm1515_vm2 = vcmp.ne.s32.totalorder %v626_v60, %v1440_v39  ;;  %vm1520_vm3 = vcmp.ne.s32.totalorder %v627_v61, %v1443_v41  ;;  %v2196_v6 = vmov 0 }
 0x12d   : > { %483 = vrot.lane.b32.xlu0 %v478_v14, %s1289_s14  ;;  %481 = vrot.lane.b32.xlu2 %v477_v15, %s1289_s14  ;;  %v457_v20 = vmax.f32 %v449_v16, 0.0  ;;  %v458_v21 = vmax.f32 %v450_v17, 0.0  ;;  %v2195_v5 = vsel %vm1515_vm2, 4294967295, %v2194_v5  ;;  %v2197_v6 = vsel %vm1520_vm3, 4294967295, %v2196_v6  ;;  %vm2211_vm14 = vmpackc.low %vm1520_vm3, %vm1515_vm2 }
 0x12e   : > { %v2198_v7 = vmov 0  ;;  %v2200_v8 = vmov 0  ;;  %v2202_v9 = vmov 0  ;;  %v2204_v10 = vmov 0 }
 0x12f   : > { %v463_v26 = vpack.c.bf16 %v458_v21, %v457_v20  ;;  %v2199_v7 = vsel %vm1525_vm4, 4294967295, %v2198_v7  ;;  %v2201_v8 = vsel %vm1530_vm5, 4294967295, %v2200_v8  ;;  %v2203_v9 = vsel %vm1535_vm6, 4294967295, %v2202_v9 }
 0x130   : > { %v375_v18 = vpop.f32.mrf.mxu0  ;;  %v394_v19 = vpop.f32.mrf.mxu1  ;;  %v2205_v10 = vsel %vm1540_vm15, 4294967295, %v2204_v10  ;;  %vm1553_vm12 = vcmp.ne.s32.totalorder %v659_v3, %v1440_v39  ;;  %v2206_v11 = vmov 0  ;;  %v2208_v12 = vmov 0 }
 0x131   : > { %v427_v22 = vmul.f32 %v419_v44, %v375_v18  ;;  %v428_v23 = vmul.f32 %v419_v44, %v394_v19  ;;  %v474_v30 = vunpack.c.h.b16 %v463_v26  ;;  %v473_v32 = vunpack.c.l.b16 %v463_v26  ;;  %v1447_v44 = vpop.permute.xlu0 %606  ;;  %v1666_v43 = vpop.permute.xlu1 %573 }
 0x132   : > { %v2207_v11 = vsel %vm1553_vm12, 4294967295, %v2206_v11  ;;  %v678_v20 = vunpack.c.l.b16 %v1435_v36  ;;  %v679_v21 = vunpack.c.h.b16 %v1435_v36  ;;  %vm577_vm15 = vcmask 15360  }
 0x133   : > { %v451_v24 = vadd.f32 %v443_v46, %v427_v22  ;;  %v452_v25 = vadd.f32 %v443_v46, %v428_v23  ;;  %v2184_v46 = vmov 0  ;;  %v645_v22 = vunpack.c.l.b16 %v640_v57 }
 0x134   : > { %v2185_v46 = vsel %vm1455_vm8, 4294967295, %v2184_v46  ;;  %v646_v23 = vunpack.c.h.b16 %v640_v57  ;;  %v578_v53 = vsel %vm577_vm15, %v1666_v43, %v1485_v52  ;;  %v2237_v3 = vmov 0 }
 0x135   : > { %v459_v27 = vmax.f32 %v451_v24, 0.0  ;;  %v460_v28 = vmax.f32 %v452_v25, 0.0  ;;  %v586_v60 = vunpack.c.l.b16 %v578_v53  ;;  %v587_v61 = vunpack.c.h.b16 %v578_v53 }
 0x137   : > { %v464_v29 = vpack.c.bf16 %v460_v28, %v459_v27  ;;  %v2216_v27 = vmov 0  ;;  %vm1753_vm3 = vcmp.ne.s32.totalorder %v586_v60, %v1440_v39 }
 0x139   : > { %v476_v31 = vunpack.c.h.b16 %v464_v29  ;;  %v475_v33 = vunpack.c.l.b16 %v464_v29  ;;  %v1465_v40 = vpop.permute.xlu0 %707 }
 0x13a   : > { %v725_v47 = vunpack.c.l.b16 %v1465_v40  ;;  %v726_v48 = vunpack.c.h.b16 %v1465_v40 }
 0x13b   : > { %v480_v34 = vpack.c.b16 %v476_v31, %v474_v30  ;;  %v479_v35 = vpack.c.b16 %v475_v33, %v473_v32  ;;  %v711_v33 = vunpack.c.l.b16 %v1463_v2 }
 0x13c   : > { %vm1472_vm10 = vcmp.ne.s32.totalorder %v725_v47, %v1440_v39  ;;  %vm1477_vm11 = vcmp.ne.s32.totalorder %v726_v48, %v1443_v41 }
 0x13d   : > { %487 = vrot.lane.b32.xlu2 %v480_v34, %s1289_s14  ;;  %485 = vrot.lane.b32.xlu1 %v479_v35, %s1289_s14  ;;  %v2187_v50 = vsel %vm1472_vm10, 4294967295, %v2186_v50  ;;  %v2189_v51 = vsel %vm1477_vm11, 4294967295, %v2188_v51  ;;  %v712_v34 = vunpack.c.h.b16 %v1463_v2  ;;  %s1156_s14 = sshll.u32 %s1359_s28, 4  ;;  %s1037_s28 = scalar_lea.sflag [#allocation3], %s284_s13 }
 0x187   : > { %v482_v58 = vpop.permute.xlu2 %481 }
 0x188   : > { %v1504_v38 = vsel %vm2144_vm1, 0, %v482_v58  ;;  %vm1558_vm1 = vcmp.ne.s32.totalorder %v660_v4, %v1443_v41  ;;  %v2239_v4 = vmov 0 }
 0x189   : > { %892 = vrot.lane.b32.xlu2 %v1504_v38, %s1290_s15  ;;  %v2209_v12 = vsel %vm1558_vm1, 4294967295, %v2208_v12  ;;  %vm2149_vm0 = vmpackc.low %vm1558_vm1, %vm1553_vm12  ;;  %vm2224_vm12 = vcmask 130048   ;;  %vm709_vm1 = vcmask 277504  }
 0x18a   : > { %v611_v32 = vsel %vm2224_vm12, %v1447_v44, %v609_v59  ;;  %v710_v48 = vsel %vm709_vm1, %v1463_v2, %v1465_v40  ;;  %vm1694_vm12 = vcmp.ne.s32.totalorder %v712_v34, %v1443_v41  ;;  %v2227_v59 = vmov 0 }
 0x18b   : > { %v619_v47 = vunpack.c.l.b16 %v611_v32  ;;  %v620_v54 = vunpack.c.h.b16 %v611_v32  ;;  %v718_v40 = vunpack.c.l.b16 %v710_v48  ;;  %v719_v52 = vunpack.c.h.b16 %v710_v48 }
 0x18c   : > { %v2228_v59 = vsel %vm1694_vm12, 4294967295, %v2227_v59  ;;  %vm2249_vm12 = vcmask 138240  }
 0x18d   : > { %vm1738_vm7 = vcmp.ne.s32.totalorder %v718_v40, %v1440_v39  ;;  %vm1743_vm8 = vcmp.ne.s32.totalorder %v719_v52, %v1443_v41 }
 0x197   : > { %v1566_v13 = vpop.permute.xlu2 %487 }
 0x198   : > { %v1570_v14 = vsel %vm2210_vm13, %v1566_v13, 0  ;;  %vm2212_vm13 = vmpackc.low %vm1530_vm5, %vm1525_vm4 }
 0x199   : > { %v1582_v15 = vsel %vm2211_vm14, %v1570_v14, 0  ;;  %v1590_v16 = vsel %vm2212_vm13, %v1570_v14, 0  ;;  %v1598_v17 = vsel %vm2150_vm9, %v1570_v14, 0  ;;  %v1606_v18 = vsel %vm2149_vm0, %v1570_v14, 0  ;;  %vm2213_vm14 = vmpackc.low %vm1477_vm11, %vm1472_vm10 }
 0x19a   : > { %v1614_v19 = vsel %vm2213_vm14, %v1570_v14, 0  ;;  %vm2214_vm13 = vcmask 138240   ;;  %vm643_vm9 = vcmask 146432   ;;  %vm1629_vm14 = vcmp.ne.s32.totalorder %v678_v20, %v1440_v39 }
 0x19b   : > { %vm2215_vm0 = vmmov %vm2214_vm13  ;;  %v2217_v27 = vsel %vm1629_vm14, 4294967295, %v2216_v27  ;;  %vm1634_vm10 = vcmp.ne.s32.totalorder %v679_v21, %v1443_v41  ;;  %vm2158_vm11 = vcmask 261120   ;;  %v644_v31 = vsel %vm643_vm9, %v640_v57, %v1437_v37 }
 0x19c   : > { %vm2159_vm6 = vmpackc.low %vm1634_vm10, %vm1629_vm14  ;;  %v677_v35 = vsel %vm2158_vm11, %v1435_v36, %v1469_v49  ;;  %v652_v37 = vunpack.c.l.b16 %v644_v31  ;;  %v653_v42 = vunpack.c.h.b16 %v644_v31  ;;  %vm1689_vm9 = vcmp.ne.s32.totalorder %v711_v33, %v1440_v39 }
 0x19d   : > { %v699_v57 = vsel %vm2159_vm6, %v1504_v38, 0  ;;  %v685_v49 = vunpack.c.l.b16 %v677_v35  ;;  %v686_v2 = vunpack.c.h.b16 %v677_v35  ;;  %vm1709_vm11 = vcmp.ne.s32.totalorder %v619_v47, %v1440_v39  ;;  %vm2250_vm14 = vmmov %vm2249_vm12 }
 0x19e   : > { %vm1699_vm15 = vcmp.ne.s32.totalorder %v652_v37, %v1440_v39  ;;  %vm1704_vm1 = vcmp.ne.s32.totalorder %v653_v42, %v1443_v41  ;;  %vm1714_vm6 = vcmp.ne.s32.totalorder %v620_v54, %v1443_v41  ;;  %v612_v20 = vunpack.c.l.b16 %v1447_v44 }
 0x19f   : > { %v484_v24 = vpop.permute.xlu0 %483  ;;  %v2230_v62 = vsel %vm1699_vm15, 4294967295, %v2229_v62  ;;  %v2232_v63 = vsel %vm1704_vm1, 4294967295, %v2231_v63  ;;  %vm1724_vm5 = vcmp.ne.s32.totalorder %v686_v2, %v1443_v41  ;;  %v2245_v31 = vmov 0  ;;  %vm2251_vm2 = vmpackc.low %vm1704_vm1, %vm1699_vm15 }
 0x1a0   : > { %v1619_v25 = vsel %vm2214_vm13, %v482_v58, %v484_v24  ;;  %v1622_v26 = vsel %vm2215_vm0, %v484_v24, 0  ;;  %vm1641_vm0 = vcmp.ne.s32.totalorder %v645_v22, %v1440_v39  ;;  %vm1646_vm13 = vcmp.ne.s32.totalorder %v646_v23, %v1443_v41 }
 0x1a1   : > { %894 = vrot.lane.b32.xlu0 %v1619_v25, %s1290_s15  ;;  %819 = vrot.lane.b32.xlu2 %v1619_v25, %s1291_s16  ;;  %vm2160_vm4 = vmpackc.low %vm1646_vm13, %vm1641_vm0  ;;  %v2225_v58 = vmov 0  ;;  %v2240_v4 = vsel %vm1724_vm5, 4294967295, %v2239_v4  ;;  %v613_v23 = vunpack.c.h.b16 %v1447_v44  ;;  %v2246_v31 = vsel %vm1753_vm3, 4294967295, %v2245_v31 }
 0x1a2   : > { %896 = vrot.lane.b32.xlu1 %v1622_v26, %s1290_s15  ;;  %v666_v36 = vsel %vm2160_vm4, %v1504_v38, 0  ;;  %v2226_v58 = vsel %vm1689_vm9, 4294967295, %v2225_v58  ;;  %vm1719_vm4 = vcmp.ne.s32.totalorder %v685_v49, %v1440_v39  ;;  %vm1758_vm9 = vcmp.ne.s32.totalorder %v587_v61, %v1443_v41  ;;  %vm2252_vm3 = vmpackc.low %vm1714_vm6, %vm1709_vm11 }
 0x1a3   : > { %v2238_v3 = vsel %vm1719_vm4, 4294967295, %v2237_v3  ;;  %v667_v34 = vsel %vm2251_vm2, %v1619_v25, 0  ;;  %v634_v35 = vsel %vm2252_vm3, %v1619_v25, 0  ;;  %vm724_vm2 = vmpackc.low %vm1743_vm8, %vm1738_vm7  ;;  %vm2258_vm7 = vnez %v2246_v31 }
 0x1a4   : > { %vm2253_vm3 = vmpackc.low %vm1646_vm13, %vm1641_vm0  ;;  %vm2261_vm13 = vnez %v2226_v58 }
 0x1a5   : > { %vm2177_vm8 = vmpackc.low %vm1758_vm9, %vm2258_vm7 }
 0x1a6   : > { %vm2259_vm0 = vmpackc.low %vm1714_vm6, %vm1709_vm11  ;;  %vm2265_vm11 = vnez %v2185_v46  ;;  %vm2266_vm6 = vnez %v2183_v45 }
 0x1a9   : > { %871 = vrot.lane.b32.xlu0 %v699_v57, %s1292_s17  ;;  %844 = vrot.lane.b32.xlu2 %v666_v36, %s1293_s18  ;;  %v733_v36 = vsel %vm724_vm2, %v1619_v25, 0 }
 0x1aa   : > { %817 = vrot.lane.b32.xlu1 %v1504_v38, %s1291_s16 }
 0x1af   : > { %v486_v24 = vpop.permute.xlu1 %485 }
 0x1b0   : > { %v491_v33 = vsel %vm2249_vm12, %v486_v24, %v1566_v13  ;;  %v1765_v44 = vsel %vm2250_vm14, 0, %v486_v24  ;;  %vm2175_vm14 = vmpackc.low %vm1724_vm5, %vm1719_vm4  ;;  %vm2254_vm12 = vnez %v2217_v27  ;;  %vm2271_vm4 = vnez %v2197_v6 }
 0x1b1   : > { %846 = vrot.lane.b32.xlu0 %v667_v34, %s1293_s18  ;;  %798 = vrot.lane.b32.xlu2 %v634_v35, %s1294_s19  ;;  %v700_v13 = vsel %vm2175_vm14, %v1619_v25, 0  ;;  %v669_v37 = vsel %vm2253_vm3, %v1765_v44, 0  ;;  %vm2255_vm15 = vmpackc.low %vm1634_vm10, %vm2254_vm12  ;;  %vm1809_vm14 = vcmp.ne.s32.totalorder %v612_v20, %v1440_v39  ;;  %v637_v27 = vsel %vm2259_vm0, %v491_v33, 0 }
 0x1b2   : > { %v702_v42 = vsel %vm2255_vm15, %v1765_v44, 0  ;;  %873 = vrot.lane.b32.xlu1 %v700_v13, %s1292_s17  ;;  %vm2260_vm10 = vnez %v2228_v59  ;;  %v736_v29 = vsel %vm724_vm2, %v491_v33, 0  ;;  %vm1829_vm3 = vcmp.ne.s32.totalorder %v613_v23, %v1443_v41  ;;  %vm2267_vm12 = vmpackc.low %vm2265_vm11, %vm2266_vm6 }
 0x1b3   : > { %vm2262_vm15 = vmpackc.low %vm2260_vm10, %vm2261_vm13  ;;  %v604_v48 = vsel %vm2177_vm8, %v491_v33, 0  ;;  %v1844_v53 = vsel %vm2267_vm12, %v1765_v44, 0  ;;  %vm2268_vm0 = vnez %v2193_v56  ;;  %vm2272_vm5 = vnez %v2195_v5 }
 0x1b4   : > { %v735_v28 = vsel %vm2262_vm15, %v1765_v44, 0  ;;  %vm2269_vm15 = vnez %v2191_v55  ;;  %vm618_vm8 = vmpackc.low %vm1829_vm3, %vm1809_vm14  ;;  %v579_v5 = vunpack.c.l.b16 %v1666_v43  ;;  %v580_v6 = vunpack.c.h.b16 %v1666_v43 }
 0x1b5   : > { %vm2270_vm1 = vmpackc.low %vm2268_vm0, %vm2269_vm15  ;;  %v633_v49 = vsel %vm618_vm8, %v1504_v38, 0  ;;  %vm2295_vm14 = vnez %v2189_v51 }
 0x1b6   : > { %v1851_v54 = vsel %vm2270_vm1, %v491_v33, 0  ;;  %vm2273_vm6 = vmpackc.low %vm2271_vm4, %vm2272_vm5  ;;  %vm2274_vm4 = vnez %v2201_v8  ;;  %vm2275_vm5 = vnez %v2199_v7  ;;  %vm1897_vm12 = vcmp.ne.s32.totalorder %v579_v5, %v1440_v39 }
 0x1b7   : > { %v635_v57 = vsel %vm2273_vm6, %v1622_v26, 0  ;;  %vm2276_vm1 = vmpackc.low %vm2274_vm4, %vm2275_vm5  ;;  %vm2286_vm5 = vnez %v2209_v12  ;;  %v636_v12 = vsel %vm618_vm8, %v1765_v44, 0  ;;  %vm2296_vm8 = vnez %v2187_v50 }
 0x1b8   : > { %v701_v2 = vsel %vm2276_vm1, %v1622_v26, 0  ;;  %vm2277_vm2 = vmpackc.low %vm1758_vm9, %vm2258_vm7  ;;  %vm1902_vm9 = vcmp.ne.s32.totalorder %v580_v6, %v1443_v41  ;;  %vm2287_vm1 = vnez %v2207_v11 }
 0x1b9   : > { %800 = vrot.lane.b32.xlu0 %v635_v57, %s1294_s19  ;;  %921 = vrot.lane.b32.xlu2 %v733_v36, %s1295_s20  ;;  %v601_v40 = vsel %vm2277_vm2, %v1619_v25, 0  ;;  %vm2278_vm6 = vmpackc.low %vm2260_vm10, %vm2261_vm13  ;;  %vm2283_vm10 = vnez %v2205_v10  ;;  %vm2284_vm13 = vnez %v2203_v9 }
 0x1ba   : > { %796 = vrot.lane.b32.xlu1 %v633_v49, %s1294_s19  ;;  %v732_v7 = vsel %vm2278_vm6, %v1504_v38, 0  ;;  %vm585_vm7 = vmpackc.low %vm1902_vm9, %vm1897_vm12  ;;  %vm2289_vm6 = vnez %v2240_v4  ;;  %vm904_vm12 = vcmask 777216   ;;  %vm856_vm9 = vcmask 900096  }
 0x1bb   : > { %vm2285_vm4 = vmpackc.low %vm2283_vm10, %vm2284_vm13  ;;  %v600_v41 = vsel %vm585_vm7, %v1504_v38, 0  ;;  %vm2290_vm10 = vnez %v2238_v3  ;;  %v603_v58 = vsel %vm585_vm7, %v1765_v44, 0  ;;  %vm883_vm7 = vcmask 785408  }
 0x1bc   : > { %v602_v39 = vsel %vm2285_vm4, %v1622_v26, 0  ;;  %vm2288_vm2 = vmpackc.low %vm2286_vm5, %vm2287_vm1  ;;  %vm2292_vm4 = vnez %v2232_v63  ;;  %vm2293_vm5 = vnez %v2230_v62 }
 0x1bd   : > { %v668_v9 = vsel %vm2288_vm2, %v1622_v26, 0  ;;  %vm2291_vm13 = vmpackc.low %vm2289_vm6, %vm2290_vm10  ;;  %vm808_vm2 = vcmask 916480   ;;  %vm781_vm6 = vcmask 1031168   ;;  %vm931_vm10 = vcmask 769024  }
 0x1be   : > { %v703_v10 = vsel %vm2291_vm13, %v491_v33, 0  ;;  %vm2294_vm1 = vmpackc.low %vm2292_vm4, %vm2293_vm5  ;;  %vm829_vm13 = vcmask 908288   ;;  %vm2298_vm4 = vcmask 261120   ;;  %vm754_vm5 = vcmask 1039360  }
 0x1bf   : > { %v670_v11 = vsel %vm2294_vm1, %v491_v33, 0  ;;  %vm2297_vm3 = vmpackc.low %vm2295_vm14, %vm2296_vm8  ;;  %vm2300_vm14 = vnez %v2183_v45 }
 0x1c0   : > { %vm2299_vm1 = vmmov %vm2298_vm4 }
 0x1c1   : > { %875 = vrot.lane.b32.xlu0 %v701_v2, %s1292_s17  ;;  %771 = vrot.lane.b32.xlu2 %v601_v40, %s1296_s21  ;;  %vm2301_vm8 = vmpackc.low %vm2265_vm11, %vm2300_vm14 }
 0x1c2   : > { %919 = vrot.lane.b32.xlu1 %v732_v7, %s1295_s20 }
 0x1c9   : > { %773 = vrot.lane.b32.xlu0 %v602_v39, %s1296_s21  ;;  %823 = vrot.lane.b32.xlu2 %v1765_v44, %s1291_s16  ;;  %v941_v39 = vld [vmem:[%s2140_s5 + $0x8] sm:$0xf] }
 0x1ca   : > { %769 = vrot.lane.b32.xlu1 %v600_v41, %s1296_s21 }
 0x1d1   : > { %748 = vrot.lane.b32.xlu2 %v1765_v44, %s1297_s22  ;;  %898 = vrot.lane.b32.xlu0 %v1765_v44, %s1290_s15 }
 0x1d2   : > { %848 = vrot.lane.b32.xlu1 %v668_v9, %s1293_s18 }
 0x1d9   : > { %827 = vrot.lane.b32.xlu2 %v1570_v14, %s1291_s16  ;;  %825 = vrot.lane.b32.xlu0 %v491_v33, %s1291_s16 }
 0x1da   : > { %900 = vrot.lane.b32.xlu1 %v491_v33, %s1290_s15 }
 0x1e1   : > { %750 = vrot.lane.b32.xlu0 %v491_v33, %s1297_s22  ;;  %879 = vrot.lane.b32.xlu2 %v703_v10, %s1292_s17 }
 0x1e2   : > { %902 = vrot.lane.b32.xlu1 %v1570_v14, %s1290_s15  ;;  %s1128_s15 = sshll.u32 %s284_s13, 4 }
 0x1e3   : > { %v893_v52 = vpop.permute.xlu2 %892 }
 0x1e9   : > { %850 = vrot.lane.b32.xlu2 %v669_v37, %s1293_s18  ;;  %852 = vrot.lane.b32.xlu0 %v670_v11, %s1293_s18  ;;  %v946_v11 = vunpack.c.l.b16 %v941_v39 }
 0x1ea   : > { %752 = vrot.lane.b32.xlu1 %v1570_v14, %s1297_s22 }
 0x1f1   : > { %802 = vrot.lane.b32.xlu2 %v636_v12, %s1294_s19  ;;  %804 = vrot.lane.b32.xlu0 %v637_v27, %s1294_s19 }
 0x1f2   : > { %877 = vrot.lane.b32.xlu1 %v702_v42, %s1292_s17 }
 0x1f9   : > { %925 = vrot.lane.b32.xlu2 %v735_v28, %s1295_s20  ;;  %927 = vrot.lane.b32.xlu0 %v736_v29, %s1295_s20 }
 0x1fa   : > { %806 = vrot.lane.b32.xlu1 %v1582_v15, %s1294_s19  ;;  %s286_s19 = scalar_lea.vmem [#allocation2], %s1128_s15 }
 0x1fb   : > { %v1972_v14 = vpop.permute.xlu2 %819 }
 0x201   : > { %779 = vrot.lane.b32.xlu2 %v1598_v17, %s1296_s21  ;;  %775 = vrot.lane.b32.xlu0 %v603_v58, %s1296_s21  ;;  %v734_v17 = vsel %vm2297_vm3, %v1622_v26, 0  ;;  %vm2302_vm3 = vmpackc.low %vm2268_vm0, %vm2269_vm15 }
 0x202   : > { %881 = vrot.lane.b32.xlu1 %v1590_v16, %s1292_s17 }
 0x203   : > { %v845_v59 = vpop.permute.xlu2 %844 }
 0x209   : > { %744 = vrot.lane.b32.xlu2 %v1619_v25, %s1297_s22  ;;  %854 = vrot.lane.b32.xlu0 %v1606_v18, %s1293_s18  ;;  %s1048_s18 = scalar_lea.hbm %s2142_s7, %s1156_s14 }
 0x20a   : > { %777 = vrot.lane.b32.xlu1 %v604_v48, %s1296_s21  ;;  %s1052_s21 = sshll.u32 %s1048_s18, 4  ;;  %s1053_s21 = int_to_ptr.hbm [resolvable:$true] %s1052_s21 }
 0x20b   : > { %v799_v15 = vpop.permute.xlu2 %798 }
 0x211   : > { %923 = vrot.lane.b32.xlu2 %v734_v17, %s1295_s20  ;;  %929 = vrot.lane.b32.xlu0 %v1614_v19, %s1295_s20  ;;  %s1050_s20 = sshll.u32 %s286_s19, 4  ;;  %s1051_s20 = int_to_ptr.vmem [resolvable:$true] %s1050_s20 }
 0x212   : > { %742 = vrot.lane.b32.xlu1 %v1504_v38, %s1297_s22 }
 0x213   : > { %v895_v16 = vpop.permute.xlu0 %894  ;;  %v2004_v61 = vpop.permute.xlu2 %921 }
 0x214   : > { %v897_v18 = vpop.permute.xlu1 %896  ;;  %v905_v29 = vsel %vm904_vm12, %v893_v52, %v895_v16 }
 0x215   : > { %v2002_v60 = vsel %vm904_vm12, %v895_v16, %v897_v18  ;;  %v940_v16 = vld [vmem:[%s2140_s5] sm:$0xff] }
 0x219   : > { %746 = vrot.lane.b32.xlu0 %v1622_v26, %s1297_s22  ;;  %s1232_s22 = sshra.s32 %s1053_s21, 4  ;;  %s1233_s22 = int_to_ptr.hbm [resolvable:$true] %s1232_s22 }
 0x21a   : > { %821 = vrot.lane.b32.xlu1 %v1622_v26, %s1291_s16  ;;  %s1234_s23 = scalar_lea.hbm %s1233_s22, 16  ;;  %p1239_p0 = scmp.lt.s32.totalorder %s1233_s22, %s2142_s7 }
 0x21b   : > { %v872_v50 = vpop.permute.xlu0 %871  ;;  %v772_v19 = vpop.permute.xlu2 %771  ;;  %p1235_p11 = scmp.ne.s32.totalorder %s1233_s22, %s1234_s23  ;;  %p1240_p1 = scmp.lt.s32.totalorder %s1238_s9, %s1234_s23 }
 0x21c   : > { %v2010_v51 = vpop.permute.xlu1 %817 }
 0x21d   : > { %p1236_p12 = pnand %p1235_p11, %p1376_p5  ;;  %p1241_p2 = por %p1240_p1, %p1239_p0 }
 0x21f   : > { %p1237_p13 = pneg %p1236_p12 }
 0x221   : > { %p1242_p3 = pnand %p1241_p2, %p1237_p13 }
 0x223   : > { %v847_v62 = vpop.permute.xlu0 %846  ;;  %v2014_v3 = vpop.permute.xlu2 %823 }
 0x224   : > { %v874_v63 = vpop.permute.xlu1 %873  ;;  %v857_v0 = vsel %vm856_vm9, %v845_v59, %v847_v62  ;;  %v949_v59 = vpack.c.b16 %v946_v11, %v946_v11 }
 0x225   : > { %v884_v1 = vsel %vm883_vm7, %v872_v50, %v874_v63 }
 0x22b   : > { %v801_v4 = vpop.permute.xlu0 %800  ;;  %v2020_v24 = vpop.permute.xlu2 %748 }
 0x22c   : > { %v797_v20 = vpop.permute.xlu1 %796  ;;  %v810_v21 = vsel %vm808_vm2, %v799_v15, %v801_v4 }
 0x22d   : > { %v809_v43 = vsel %vm808_vm2, %v797_v20, %v799_v15 }
 0x233   : > { %v876_v26 = vpop.permute.xlu0 %875  ;;  %v2028_v34 = vpop.permute.xlu2 %827 }
 0x234   : > { %v920_v22 = vpop.permute.xlu1 %919  ;;  %v2018_v23 = vsel %vm883_vm7, %v874_v63, %v876_v26  ;;  %v830_v63 = vsel %vm829_vm13, %v2010_v51, %v1972_v14 }
 0x235   : > { %v932_v58 = vsel %vm931_vm10, %v920_v22, %v2004_v61 }
 0x23b   : > { %v774_v31 = vpop.permute.xlu0 %773  ;;  %v880_v42 = vpop.permute.xlu2 %879 }
 0x23c   : > { %v770_v32 = vpop.permute.xlu1 %769  ;;  %v2023_v33 = vsel %vm781_vm6, %v772_v19, %v774_v31 }
 0x23d   : > { %v2026_v44 = vsel %vm781_vm6, %v770_v32, %v772_v19 }
 0x243   : > { %v899_v35 = vpop.permute.xlu0 %898  ;;  %v851_v30 = vpop.permute.xlu2 %850 }
 0x244   : > { %v849_v13 = vpop.permute.xlu1 %848 }
 0x245   : > { %v2031_v37 = vsel %vm856_vm9, %v847_v62, %v849_v13  ;;  %v945_v62 = vunpack.c.h.b16 %v940_v16 }
 0x24b   : > { %v2033_v47 = vpop.permute.xlu0 %825  ;;  %v803_v5 = vpop.permute.xlu2 %802 }
 0x24c   : > { %v901_v27 = vpop.permute.xlu1 %900  ;;  %v832_v19 = vsel %vm829_vm13, %v2014_v3, %v2033_v47 }
 0x24d   : > { %v907_v28 = vsel %vm904_vm12, %v899_v35, %v901_v27 }
 0x24e   : > { %969 = vmatpush.bf16.msra.mxu3 %v907_v28  ;;  %v944_v28 = vunpack.c.l.b16 %v940_v16 }
 0x252   : > { %970 = vmatpush.bf16.msra.mxu3 %v905_v29 }
 0x253   : > { %v2037_v48 = vpop.permute.xlu0 %750  ;;  %v926_v8 = vpop.permute.xlu2 %925 }
 0x254   : > { %v903_v57 = vpop.permute.xlu1 %902  ;;  %v757_v35 = vsel %vm754_vm5, %v2020_v24, %v2037_v48  ;;  %v833_v24 = vsel %vm829_vm13, %v2033_v47, %v2028_v34  ;;  %v561_v34 = vsel %vm2301_vm8, %v1504_v38, 0 }
 0x255   : > { %v908_v17 = vsel %vm904_vm12, %v901_v27, %v903_v57 }
 0x25b   : > { %v853_v36 = vpop.permute.xlu0 %852  ;;  %v780_v15 = vpop.permute.xlu2 %779 }
 0x25c   : > { %v2039_v49 = vpop.permute.xlu1 %752  ;;  %v859_v12 = vsel %vm856_vm9, %v851_v30, %v853_v36 }
 0x263   : > { %v805_v6 = vpop.permute.xlu0 %804  ;;  %v745_v4 = vpop.permute.xlu2 %744 }
 0x264   : > { %v878_v2 = vpop.permute.xlu1 %877  ;;  %v811_v40 = vsel %vm808_vm2, %v803_v5, %v805_v6 }
 0x265   : > { %956 = vmatpush.bf16.msrb.mxu0 %v811_v40  ;;  %v886_v7 = vsel %vm883_vm7, %v878_v2, %v880_v42 }
 0x266   : > { %971 = vmatpush.bf16.msra.mxu3 %v886_v7 }
 0x269   : > { %957 = vmatpush.bf16.msrb.mxu0 %v809_v43 }
 0x26a   : > { %972 = vmatpush.bf16.msra.mxu3 %v884_v1 }
 0x26b   : > { %v928_v41 = vpop.permute.xlu0 %927  ;;  %v924_v32 = vpop.permute.xlu2 %923 }
 0x26c   : > { %v807_v9 = vpop.permute.xlu1 %806  ;;  %v934_v10 = vsel %vm931_vm10, %v926_v8, %v928_v41 }
 0x26d   : > { %988 = vmatpush.bf16.msra.mxu2 %v934_v10  ;;  %v812_v52 = vsel %vm808_vm2, %v805_v6, %v807_v9 }
 0x26e   : > { %973 = vmatpush.bf16.msra.mxu3 %v859_v12  ;;  %995 = vmatpush.bf16.msrb.mxu1 %v812_v52 }
 0x271   : > { %989 = vmatpush.bf16.msra.mxu2 %v932_v58 }
 0x272   : > { %974 = vmatpush.bf16.msra.mxu3 %v857_v0  ;;  %996 = vmatpush.bf16.msrb.mxu1 %v810_v21  ;;  %v948_v0 = vpack.c.b16 %v945_v62, %v945_v62 }
 0x273   : > { %v776_v18 = vpop.permute.xlu0 %775 }
 0x274   : > { %v882_v50 = vpop.permute.xlu1 %881  ;;  %1145 = vmatmul.msk.bf16.vlgmr.msra.gmra.mxu2 %vm2298_vm4, %v949_v59 }
 0x275   : > { %1008 = vmatpush.bf16.msrb.mxu2 %v908_v17  ;;  %v887_v1 = vsel %vm883_vm7, %v880_v42, %v882_v50 }
 0x276   : > { %975 = vmatpush.bf16.msra.mxu3 %v832_v19 }
 0x279   : > { %1009 = vmatpush.bf16.msrb.mxu2 %v2002_v60 }
 0x27a   : > { %976 = vmatpush.bf16.msra.mxu3 %v830_v63 }
 0x27b   : > { %v855_v20 = vpop.permute.xlu0 %854 }
 0x27c   : > { %v778_v21 = vpop.permute.xlu1 %777  ;;  %v860_v60 = vsel %vm856_vm9, %v853_v36, %v855_v20 }
 0x27d   : > { %1010 = vmatpush.bf16.msrb.mxu2 %v887_v1  ;;  %v784_v26 = vsel %vm781_vm6, %v776_v18, %v778_v21  ;;  %977 = vmatmul.bf16.vlgmr.msra.gmra.mxu3 %v948_v0  ;;  %v785_v3 = vsel %vm781_vm6, %v778_v21, %v780_v15 }
 0x27e   : > { %958 = vmatpush.bf16.msrb.mxu0 %v784_v26  ;;  %997 = vmatpush.bf16.msrb.mxu1 %v785_v3 }
 0x281   : > { %1011 = vmatpush.bf16.msrb.mxu2 %v2018_v23  ;;  %v758_v23 = vsel %vm754_vm5, %v2037_v48, %v2039_v49 }
 0x282   : > { %959 = vmatpush.bf16.msrb.mxu0 %v2026_v44  ;;  %998 = vmatpush.bf16.msrb.mxu1 %v2023_v33  ;;  %v933_v33 = vsel %vm931_vm10, %v2004_v61, %v924_v32 }
 0x283   : > { %v930_v51 = vpop.permute.xlu0 %929 }
 0x284   : > { %v743_v22 = vpop.permute.xlu1 %742  ;;  %v935_v31 = vsel %vm931_vm10, %v928_v41, %v930_v51 }
 0x285   : > { %1012 = vmatpush.bf16.msrb.mxu2 %v860_v60  ;;  %1027 = vmatpush.bf16.msrb.mxu3 %v935_v31  ;;  %v755_v44 = vsel %vm754_vm5, %v743_v22, %v745_v4 }
 0x286   : > { %960 = vmatpush.bf16.msrb.mxu0 %v757_v35  ;;  %999 = vmatpush.bf16.msrb.mxu1 %v758_v23 }
 0x289   : > { %1013 = vmatpush.bf16.msrb.mxu2 %v2031_v37  ;;  %1028 = vmatpush.bf16.msrb.mxu3 %v933_v33  ;;  %v947_v37 = vpack.c.b16 %v944_v28, %v944_v28 }
 0x28a   : > { %961 = vmatpush.bf16.msrb.mxu0 %v755_v44 }
 0x28b   : > { %v747_v13 = vpop.permute.xlu0 %746 }
 0x28c   : > { %v822_v42 = vpop.permute.xlu1 %821  ;;  %v756_v27 = vsel %vm754_vm5, %v745_v4, %v747_v13 }
 0x28d   : > { %1014 = vmatpush.bf16.msrb.mxu2 %v833_v24  ;;  %1000 = vmatpush.bf16.msrb.mxu1 %v756_v27  ;;  %v831_v61 = vsel %vm829_vm13, %v1972_v14, %v822_v42 }
 0x28e   : > { %1146 = vmatmul.msk.bf16.vlgmr.msrb.gmra.mxu3 %vm2299_vm1, %v949_v59  ;;  %962 = vmatpush.bf16.msrb.mxu0 %v1844_v53  ;;  %v562_v53 = vsel %vm2302_vm3, %v1619_v25, 0 }
 0x291   : > { %1015 = vmatpush.bf16.msrb.mxu2 %v831_v61  ;;  %1001 = vmatpush.bf16.msrb.mxu1 %v1851_v54 }
 0x292   : > { %963 = vmatpush.bf16.msrb.mxu0 %v561_v34 }
 0x294   : > { %1016 = vmatmul.bf16.vlgmr.msrb.gmra.mxu2 %v948_v0 }
 0x295   : > { %964 = vmatmul.bf16.vlgmr.msrb.gmra.mxu0 %v947_v37  ;;  %1002 = vmatpush.bf16.msrb.mxu1 %v562_v53 }
 0x298   : > { %1003 = vmatmul.bf16.vlgmr.msrb.gmra.mxu1 %v947_v37 }
 0x2f7   : > { %v991_v46 = vpop.f32.mrf.mxu2 }
 0x2ff   : > { %v993_v14 = vpop.f32.mrf.mxu2 }
 0x300   : > { %v978_v45 = vpop.f32.mrf.mxu3 }
 0x308   : > { %v980_v47 = vpop.f32.mrf.mxu3 }
 0x311   : > { %v1030_v38 = vpop.f32.mrf.mxu3 }
 0x312   : > { %v965_v54 = vpop.f32.mrf.mxu0 }
 0x313   : > { %v979_v56 = vadd.f32 %v978_v45, %v965_v54 }
 0x315   : > { %v992_v55 = vadd.f32 %v991_v46, %v979_v56  ;;  %v1004_v25 = vpop.f32.mrf.mxu1 }
 0x317   : > { %v1017_v29 = vpop.f32.mrf.mxu2  ;;  %1034 = vst [vmem:[%s286_s19] sm:$0xff] %v992_v55 }
 0x318   : > { %v1018_v30 = vadd.f32 %v1017_v29, %v1004_v25 }
 0x319   : > { %v1032_v57 = vpop.f32.mrf.mxu3 }
 0x31a   : > { %v1031_v48 = vadd.f32 %v1030_v38, %v1018_v30  ;;  %v967_v36 = vpop.f32.mrf.mxu0 }
 0x31c   : > { %1035 = vst [vmem:[%s286_s19 + $0x8] sm:$0xff] %v1031_v48 }
 0x31d   : > { %1245 = shalt.err (!%p1242_p3)
}
 0x31e   : > { %1157 = dma.vmem_to_hbm [thread:$0]  (%p1376_p5), %s1051_s20, 256, %s1053_s21, %s1037_s28   ;;  %v1006_v5 = vpop.f32.mrf.mxu1 }
 0x31f   : > { %v1019_v49 = vpop.f32.mrf.mxu2 }
 0x320 PF: > { %p1163_p4 = scmp.ge.s32.totalorder %s1280_s27, 2  ;;  %s1064_s13 = sand.u32 1, %s1268_s24  }
 0x321   : > { %s1065_s16 = scalar_lea.sflag [#allocation3], %s1064_s13 }
 0x322   : > { %p1160_p7 = pnand %p1163_p4, %p1380_p6 }
 0x324   : > { %p1161_p8 = pneg %p1160_p7 }
 0x326   : > { %1263 = dma.done.wait (%p1161_p8), %s1065_s16, 256  }
 0x327   : > { %1265 = vsyncadd (%p1161_p8), %s1065_s16, 4294967040  ;;  %p17_p5 = scmp.ge.s32.totalorder %s1363_s30, 4   ;;  %s2303_s24 = smov %s1272_s25 }
 0x328   : > { %s2304_s25 = smov %s1276_s26  ;;  %s2305_s26 = smov %s1374_s10 }
 0x329   : > { %s2306_s27 = smov %s1363_s30  ;;  %19 = sbr.rel (!%p17_p5) target bundleno = 3 (0x3), region = 86 }
 0x32e   :  { %1071 = vsyncpa [#allocation3], 1 }
 0x32f   :  { %1073 = vsyncpa [#allocation3 + $0x1], 1 }

</bundles_post_ra>
